<compile_context>
chip_gen: v6e
topology: v6e:2x2x1
jax: 0.10.0
libtpu: 0.0.40
codegen_flags: <defaults>
</compile_context>

<pallas_src>
import functools

import jax
import jax.numpy as jnp
from jax.experimental import pallas as pl
from jax.experimental.pallas import tpu as pltpu

NUM_VIEWS = 4
MARGIN = 0.3
_MIB = 1024 * 1024

_VMEM_CAP_CACHE = []


def _vmem_capacity_bytes():
    """Best-effort physical VMEM capacity query (falls back to 128 MiB)."""
    if not _VMEM_CAP_CACHE:
        cap = 128 * _MIB
        try:
            info = pltpu.get_tpu_info()
            for attr in ("vmem_capacity_bytes", "vmem_size_bytes", "vmem_bytes"):
                v = getattr(info, attr, None)
                if v:
                    cap = int(v)
                    break
        except Exception:
            pass
        _VMEM_CAP_CACHE.append(cap)
    return _VMEM_CAP_CACHE[0]


def _shared_shared_loss_kernel(x_ref, out_ref, acc_ref, *, num_views, dim,
                               chunks_per_block, blocks_per_split,
                               total_chunks, margin):
    s = pl.program_id(0)   # "parallel" split axis (two TensorCores on v7x)
    i = pl.program_id(1)   # "arbitrary" accumulation axis over chunk blocks

    @pl.when(i == 0)
    def _init():
        acc_ref[...] = jnp.zeros_like(acc_ref)

    x = x_ref[...].astype(jnp.float32)                       # (Cb, V*D), lane-dense

    # Per-view lane slices: stay in the native (Cb, D) layout, no reshape, no MXU.
    views = [x[:, m * dim:(m + 1) * dim] for m in range(num_views)]

    # Row norms (lane reduce) and F.normalize(eps=1e-12) reciprocal norms (EUP rsqrt).
    ss = [jnp.sum(v * v, axis=1, keepdims=True) for v in views]          # (Cb, 1)
    inv = [jnp.where(t > 1e-24, jax.lax.rsqrt(t), 1e12) for t in ss]
    # ||xn||^2 (== 1 except sub-eps rows; keeps parity with F.normalize there).
    sqn = [t * r * r for t, r in zip(ss, inv)]

    # Pairwise squared distances between normalized views of the same chunk.
    # Raw dots on x, rescaled by inv norms (xn never materialized).  Track the
    # per-view max over its 3 partners; sqrt applied once per view (monotone).
    max_d2 = [jnp.full_like(ss[0], -jnp.inf) for _ in range(num_views)]
    for m in range(num_views):
        for n in range(m + 1, num_views):
            ndot = jnp.sum(views[m] * views[n], axis=1, keepdims=True) * (inv[m] * inv[n])
            d2 = sqn[m] + sqn[n] - 2.0 * ndot
            max_d2[m] = jnp.maximum(max_d2[m], d2)
            max_d2[n] = jnp.maximum(max_d2[n], d2)

    # MarginRankingLoss(0, max_dist, y=1) = mean_i relu(max_dist_i + margin);
    # the 1/num_views mean is folded into the block partial sum below.
    per_chunk = jnp.zeros_like(ss[0])
    for m in range(num_views):
        dist = jnp.sqrt(jnp.maximum(max_d2[m], 1e-12))
        per_chunk = per_chunk + jnp.maximum(dist + margin, 0.0)

    # Mask chunks past the valid batch (partial tail block / clamped overflow
    # block).  Keep this a SELECT so garbage in padded rows cannot leak through.
    block_idx = s * blocks_per_split + i
    cid = block_idx * chunks_per_block + jax.lax.broadcasted_iota(
        jnp.int32, per_chunk.shape, 0)
    per_chunk = jnp.where(cid < total_chunks, per_chunk, 0.0)

    acc_ref[...] += jnp.sum(per_chunk, axis=0, keepdims=True) * (1.0 / num_views)

    @pl.when(i == pl.num_programs(1) - 1)
    def _finalize():
        # Lane-dense, (8,128)-aligned output block; only [0,0,0] is consumed.
        out_ref[...] = jnp.broadcast_to(acc_ref[...].reshape(1, 1, 1), out_ref.shape)


@functools.partial(jax.jit,
                   static_argnames=("num_views", "margin", "block_bytes_target"))
def shared_shared_loss(shared_features, num_views=NUM_VIEWS, margin=MARGIN,
                       block_bytes_target=None):
    B, D = shared_features.shape
    total_chunks = B // num_views
    if total_chunks == 0:
        return jnp.zeros((), jnp.float32)

    itemsize = jnp.dtype(shared_features.dtype).itemsize
    feat = num_views * D
    row_in_bytes = feat * itemsize
    row_f32_bytes = feat * 4

    vmem_cap = _vmem_capacity_bytes()
    if block_bytes_target is None:
        # ~4 MiB f32 working block on 64 MiB-VMEM parts (v7x), 8 MiB on 128 MiB parts.
        block_bytes_target = 4 * _MIB if vmem_cap <= 64 * _MIB else 8 * _MIB

    # Chunk-row granularity: sublane tile for the input dtype (8 rows f32, 16 bf16).
    gran = max(8, 32 // itemsize)
    chunk_blk = max(gran, (block_bytes_target // row_f32_bytes) // gran * gran)

    # Drop trailing rows (B % num_views) and view each chunk as one contiguous,
    # lane-dense row of length num_views*D (contiguity-preserving HBM reshape).
    xr = shared_features[: total_chunks * num_views].reshape(total_chunks, feat)
    if total_chunks >= gran:
        chunk_blk = min(chunk_blk, (total_chunks // gran) * gran)
        padded_chunks = total_chunks
    else:
        chunk_blk = gran
        padded_chunks = gran
        xr = jnp.pad(xr, ((0, gran - total_chunks), (0, 0)))   # tiny inputs only

    n_blocks = pl.cdiv(padded_chunks, chunk_blk)
    # Unconditional 2-way split over blocks: both v7x TensorCores stream half the
    # batch; on 1-TC parts the (at most one) clamped+masked duplicate block and
    # the 2-element host sum are negligible.
    num_splits = 2 if n_blocks >= 2 else 1
    blocks_per_split = pl.cdiv(n_blocks, num_splits)
    last_block = n_blocks - 1

    def x_index_map(s, i, _bps=blocks_per_split, _last=last_block):
        # Clamp so the overflow step of an odd block count never DMAs out of range;
        # its contribution is masked in-kernel via the chunk-id select.
        return (jnp.minimum(s * _bps + i, _last), 0)

    block_in_bytes = chunk_blk * row_in_bytes
    block_f32_bytes = chunk_blk * row_f32_bytes
    vmem_limit = 2 * block_in_bytes + 4 * block_f32_bytes + 8 * _MIB
    vmem_limit = int(min(max(vmem_limit, 32 * _MIB), vmem_cap * 3 // 4))

    rows_used = total_chunks * num_views
    cost = pl.CostEstimate(
        flops=int(6 * rows_used * D),
        transcendentals=int(2 * rows_used),
        bytes_accessed=int(rows_used * D * itemsize) + num_splits * 8 * 128 * 4,
    )

    kernel = functools.partial(
        _shared_shared_loss_kernel,
        num_views=num_views,
        dim=D,
        chunks_per_block=chunk_blk,
        blocks_per_split=blocks_per_split,
        total_chunks=total_chunks,
        margin=margin,
    )

    partials = pl.pallas_call(
        kernel,
        grid=(num_splits, blocks_per_split),
        in_specs=[pl.BlockSpec((chunk_blk, feat), x_index_map)],
        out_specs=pl.BlockSpec((1, 8, 128), lambda s, i: (s, 0, 0)),
        out_shape=jax.ShapeDtypeStruct((num_splits, 8, 128), jnp.float32),
        scratch_shapes=[pltpu.VMEM((1, 1), jnp.float32)],
        compiler_params=pltpu.CompilerParams(
            dimension_semantics=("parallel", "arbitrary"),
            vmem_limit_bytes=vmem_limit,
        ),
        cost_estimate=cost,
    )(xr)

    return jnp.sum(partials[:, 0, 0])


def _reference_loss(x, num_views=NUM_VIEWS, margin=MARGIN):
    """Pure-JAX reference mirroring the PyTorch module exactly."""
    B, _ = x.shape
    chunk_size = B // num_views
    total = jnp.zeros((), jnp.float32)
    for c in range(chunk_size):
        xc = x[num_views * c:num_views * (c + 1)].astype(jnp.float32)
        norm = jnp.linalg.norm(xc, axis=1, keepdims=True)
        xn = xc / jnp.maximum(norm, 1e-12)
        sq = jnp.sum(xn * xn, axis=1, keepdims=True)
        d2 = sq + sq.T - 2.0 * (xn @ xn.T)
        dist = jnp.sqrt(jnp.maximum(d2, 1e-12))
        dist = jnp.where(jnp.eye(num_views, dtype=bool), -jnp.inf, dist)
        max_dist = jnp.max(dist, axis=1)
        total = total + jnp.mean(jnp.maximum(max_dist + margin, 0.0))
    return total


if __name__ == "__main__":
    key = jax.random.PRNGKey(0)
    k0, k1, k2 = jax.random.split(key, 3)

    # Primary small case: batch = 8 (2 chunks of 4 views), feature dim = 32.
    x = jax.random.normal(k0, (8, 32), dtype=jnp.float32)
    loss = jax.block_until_ready(shared_shared_loss(x))
    ref = _reference_loss(x)
    assert jnp.allclose(loss, ref, rtol=1e-4, atol=1e-4), (loss, ref)

    # Multi-block grid + 2-way split (forced small blocks: 64 chunks -> 8 blocks of 8).
    x2 = jax.random.normal(k1, (256, 32), dtype=jnp.float32)
    loss2 = jax.block_until_ready(shared_shared_loss(x2, block_bytes_target=4096))
    ref2 = _reference_loss(x2)
    assert jnp.allclose(loss2, ref2, rtol=1e-4, atol=1e-4), (loss2, ref2)

    # Ragged case: trailing rows dropped (B % 4 != 0), partial tail block, and an
    # odd block count exercising the clamped + masked overflow block of the split.
    x3 = jax.random.normal(k2, (134, 32), dtype=jnp.float32)
    loss3 = jax.block_until_ready(shared_shared_loss(x3, block_bytes_target=4096))
    ref3 = _reference_loss(x3)
    assert jnp.allclose(loss3, ref3, rtol=1e-4, atol=1e-4), (loss3, ref3)

    print("KERNEL_OK")
</pallas_src>

<mosaic_0001>
module attributes {stable_mosaic.version = 11 : i64} {
  func.func @_shared_shared_loss_kernel(%arg0: i32, %arg1: i32, %arg2: memref<8x128xf32, #tpu.memory_space<vmem>>, %arg3: memref<1x8x128xf32, #tpu.memory_space<vmem>>, %arg4: memref<1x1xf32, #tpu.memory_space<vmem>>) attributes {dimension_semantics = [#tpu.dimension_semantics<parallel>, #tpu.dimension_semantics<arbitrary>], iteration_bounds = array<i64: 1, 1>, scalar_prefetch = 0 : i64, scratch_operands = 1 : i64, tpu.core_type = #tpu.core_type<tc>, window_params = [{transform_indices = @transform_0, window_bounds = array<i64: 8, 128>}, {transform_indices = @transform_1, window_bounds = array<i64: 1, 8, 128>}]} {
    %c0_i32 = arith.constant 0 : i32
    %0 = arith.cmpi eq, %arg1, %c0_i32 : i32
    %1 = arith.extui %0 : i1 to i32
    %c0_i32_0 = arith.constant 0 : i32
    %2 = arith.cmpi ne, %1, %c0_i32_0 : i32
    scf.if %2 {
      %cst_51 = arith.constant 0.000000e+00 : f32
      %171 = vector.broadcast %cst_51 : f32 to vector<1x1xf32>
      %c0_52 = arith.constant 0 : index
      %c0_53 = arith.constant 0 : index
      %172 = vector.load %arg4[%c0_52, %c0_53] : memref<1x1xf32, #tpu.memory_space<vmem>>, vector<1x1xf32>
      tpu.vector_store %arg4[%c0_52, %c0_53], %171 {strides = array<i32>} : memref<1x1xf32, #tpu.memory_space<vmem>>, vector<1x1xf32>,
    } else {
    }
    %c0 = arith.constant 0 : index
    %c0_1 = arith.constant 0 : index
    %3 = vector.load %arg2[%c0, %c0_1] : memref<8x128xf32, #tpu.memory_space<vmem>>, vector<8x128xf32>
    %4 = vector.extract_strided_slice %3 {offsets = [0, 0], sizes = [8, 32], strides = [1, 1]} : vector<8x128xf32> to vector<8x32xf32>
    %5 = vector.extract_strided_slice %3 {offsets = [0, 32], sizes = [8, 32], strides = [1, 1]} : vector<8x128xf32> to vector<8x32xf32>
    %6 = vector.extract_strided_slice %3 {offsets = [0, 64], sizes = [8, 32], strides = [1, 1]} : vector<8x128xf32> to vector<8x32xf32>
    %7 = vector.extract_strided_slice %3 {offsets = [0, 96], sizes = [8, 32], strides = [1, 1]} : vector<8x128xf32> to vector<8x32xf32>
    %8 = arith.mulf %4, %4 : vector<8x32xf32>
    %cst = arith.constant dense<0.000000e+00> : vector<8xf32>
    %9 = vector.multi_reduction <add>, %8, %cst [1] : vector<8x32xf32> to vector<8xf32>
    %10 = vector.shape_cast %9 : vector<8xf32> to vector<8x1xf32>
    %11 = arith.mulf %5, %5 : vector<8x32xf32>
    %cst_2 = arith.constant dense<0.000000e+00> : vector<8xf32>
    %12 = vector.multi_reduction <add>, %11, %cst_2 [1] : vector<8x32xf32> to vector<8xf32>
    %13 = vector.shape_cast %12 : vector<8xf32> to vector<8x1xf32>
    %14 = arith.mulf %6, %6 : vector<8x32xf32>
    %cst_3 = arith.constant dense<0.000000e+00> : vector<8xf32>
    %15 = vector.multi_reduction <add>, %14, %cst_3 [1] : vector<8x32xf32> to vector<8xf32>
    %16 = vector.shape_cast %15 : vector<8xf32> to vector<8x1xf32>
    %17 = arith.mulf %7, %7 : vector<8x32xf32>
    %cst_4 = arith.constant dense<0.000000e+00> : vector<8xf32>
    %18 = vector.multi_reduction <add>, %17, %cst_4 [1] : vector<8x32xf32> to vector<8xf32>
    %19 = vector.shape_cast %18 : vector<8xf32> to vector<8x1xf32>
    %cst_5 = arith.constant 1.000000e-24 : f32
    %20 = vector.broadcast %cst_5 : f32 to vector<8x1xf32>
    %21 = arith.cmpf ogt, %10, %20 : vector<8x1xf32>
    %22 = math.rsqrt %10 : vector<8x1xf32>
    %cst_6 = arith.constant 9.99999995E+11 : f32
    %23 = vector.broadcast %cst_6 : f32 to vector<8x1xf32>
    %24 = arith.select %21, %22, %23 : vector<8x1xi1>, vector<8x1xf32>
    %cst_7 = arith.constant 1.000000e-24 : f32
    %25 = vector.broadcast %cst_7 : f32 to vector<8x1xf32>
    %26 = arith.cmpf ogt, %13, %25 : vector<8x1xf32>
    %27 = math.rsqrt %13 : vector<8x1xf32>
    %cst_8 = arith.constant 9.99999995E+11 : f32
    %28 = vector.broadcast %cst_8 : f32 to vector<8x1xf32>
    %29 = arith.select %26, %27, %28 : vector<8x1xi1>, vector<8x1xf32>
    %cst_9 = arith.constant 1.000000e-24 : f32
    %30 = vector.broadcast %cst_9 : f32 to vector<8x1xf32>
    %31 = arith.cmpf ogt, %16, %30 : vector<8x1xf32>
    %32 = math.rsqrt %16 : vector<8x1xf32>
    %cst_10 = arith.constant 9.99999995E+11 : f32
    %33 = vector.broadcast %cst_10 : f32 to vector<8x1xf32>
    %34 = arith.select %31, %32, %33 : vector<8x1xi1>, vector<8x1xf32>
    %cst_11 = arith.constant 1.000000e-24 : f32
    %35 = vector.broadcast %cst_11 : f32 to vector<8x1xf32>
    %36 = arith.cmpf ogt, %19, %35 : vector<8x1xf32>
    %37 = math.rsqrt %19 : vector<8x1xf32>
    %cst_12 = arith.constant 9.99999995E+11 : f32
    %38 = vector.broadcast %cst_12 : f32 to vector<8x1xf32>
    %39 = arith.select %36, %37, %38 : vector<8x1xi1>, vector<8x1xf32>
    %40 = arith.mulf %10, %24 : vector<8x1xf32>
    %41 = arith.mulf %40, %24 : vector<8x1xf32>
    %42 = arith.mulf %13, %29 : vector<8x1xf32>
    %43 = arith.mulf %42, %29 : vector<8x1xf32>
    %44 = arith.mulf %16, %34 : vector<8x1xf32>
    %45 = arith.mulf %44, %34 : vector<8x1xf32>
    %46 = arith.mulf %19, %39 : vector<8x1xf32>
    %47 = arith.mulf %46, %39 : vector<8x1xf32>
    %cst_13 = arith.constant 0xFF800000 : f32
    %48 = vector.broadcast %cst_13 : f32 to vector<8x1xf32>
    %cst_14 = arith.constant 0xFF800000 : f32
    %49 = vector.broadcast %cst_14 : f32 to vector<8x1xf32>
    %cst_15 = arith.constant 0xFF800000 : f32
    %50 = vector.broadcast %cst_15 : f32 to vector<8x1xf32>
    %cst_16 = arith.constant 0xFF800000 : f32
    %51 = vector.broadcast %cst_16 : f32 to vector<8x1xf32>
    %52 = arith.mulf %4, %5 : vector<8x32xf32>
    %cst_17 = arith.constant dense<0.000000e+00> : vector<8xf32>
    %53 = vector.multi_reduction <add>, %52, %cst_17 [1] : vector<8x32xf32> to vector<8xf32>
    %54 = vector.shape_cast %53 : vector<8xf32> to vector<8x1xf32>
    %55 = arith.mulf %24, %29 : vector<8x1xf32>
    %56 = arith.mulf %54, %55 : vector<8x1xf32>
    %57 = arith.addf %41, %43 : vector<8x1xf32>
    %cst_18 = arith.constant 2.000000e+00 : f32
    %58 = vector.broadcast %cst_18 : f32 to vector<8x1xf32>
    %59 = arith.mulf %58, %56 : vector<8x1xf32>
    %60 = arith.subf %57, %59 : vector<8x1xf32>
    %61 = arith.maximumf %48, %60 : vector<8x1xf32>
    %62 = arith.maximumf %49, %60 : vector<8x1xf32>
    %63 = arith.mulf %4, %6 : vector<8x32xf32>
    %cst_19 = arith.constant dense<0.000000e+00> : vector<8xf32>
    %64 = vector.multi_reduction <add>, %63, %cst_19 [1] : vector<8x32xf32> to vector<8xf32>
    %65 = vector.shape_cast %64 : vector<8xf32> to vector<8x1xf32>
    %66 = arith.mulf %24, %34 : vector<8x1xf32>
    %67 = arith.mulf %65, %66 : vector<8x1xf32>
    %68 = arith.addf %41, %45 : vector<8x1xf32>
    %cst_20 = arith.constant 2.000000e+00 : f32
    %69 = vector.broadcast %cst_20 : f32 to vector<8x1xf32>
    %70 = arith.mulf %69, %67 : vector<8x1xf32>
    %71 = arith.subf %68, %70 : vector<8x1xf32>
    %72 = arith.maximumf %61, %71 : vector<8x1xf32>
    %73 = arith.maximumf %50, %71 : vector<8x1xf32>
    %74 = arith.mulf %4, %7 : vector<8x32xf32>
    %cst_21 = arith.constant dense<0.000000e+00> : vector<8xf32>
    %75 = vector.multi_reduction <add>, %74, %cst_21 [1] : vector<8x32xf32> to vector<8xf32>
    %76 = vector.shape_cast %75 : vector<8xf32> to vector<8x1xf32>
    %77 = arith.mulf %24, %39 : vector<8x1xf32>
    %78 = arith.mulf %76, %77 : vector<8x1xf32>
    %79 = arith.addf %41, %47 : vector<8x1xf32>
    %cst_22 = arith.constant 2.000000e+00 : f32
    %80 = vector.broadcast %cst_22 : f32 to vector<8x1xf32>
    %81 = arith.mulf %80, %78 : vector<8x1xf32>
    %82 = arith.subf %79, %81 : vector<8x1xf32>
    %83 = arith.maximumf %72, %82 : vector<8x1xf32>
    %84 = arith.maximumf %51, %82 : vector<8x1xf32>
    %85 = arith.mulf %5, %6 : vector<8x32xf32>
    %cst_23 = arith.constant dense<0.000000e+00> : vector<8xf32>
    %86 = vector.multi_reduction <add>, %85, %cst_23 [1] : vector<8x32xf32> to vector<8xf32>
    %87 = vector.shape_cast %86 : vector<8xf32> to vector<8x1xf32>
    %88 = arith.mulf %29, %34 : vector<8x1xf32>
    %89 = arith.mulf %87, %88 : vector<8x1xf32>
    %90 = arith.addf %43, %45 : vector<8x1xf32>
    %cst_24 = arith.constant 2.000000e+00 : f32
    %91 = vector.broadcast %cst_24 : f32 to vector<8x1xf32>
    %92 = arith.mulf %91, %89 : vector<8x1xf32>
    %93 = arith.subf %90, %92 : vector<8x1xf32>
    %94 = arith.maximumf %62, %93 : vector<8x1xf32>
    %95 = arith.maximumf %73, %93 : vector<8x1xf32>
    %96 = arith.mulf %5, %7 : vector<8x32xf32>
    %cst_25 = arith.constant dense<0.000000e+00> : vector<8xf32>
    %97 = vector.multi_reduction <add>, %96, %cst_25 [1] : vector<8x32xf32> to vector<8xf32>
    %98 = vector.shape_cast %97 : vector<8xf32> to vector<8x1xf32>
    %99 = arith.mulf %29, %39 : vector<8x1xf32>
    %100 = arith.mulf %98, %99 : vector<8x1xf32>
    %101 = arith.addf %43, %47 : vector<8x1xf32>
    %cst_26 = arith.constant 2.000000e+00 : f32
    %102 = vector.broadcast %cst_26 : f32 to vector<8x1xf32>
    %103 = arith.mulf %102, %100 : vector<8x1xf32>
    %104 = arith.subf %101, %103 : vector<8x1xf32>
    %105 = arith.maximumf %94, %104 : vector<8x1xf32>
    %106 = arith.maximumf %84, %104 : vector<8x1xf32>
    %107 = arith.mulf %6, %7 : vector<8x32xf32>
    %cst_27 = arith.constant dense<0.000000e+00> : vector<8xf32>
    %108 = vector.multi_reduction <add>, %107, %cst_27 [1] : vector<8x32xf32> to vector<8xf32>
    %109 = vector.shape_cast %108 : vector<8xf32> to vector<8x1xf32>
    %110 = arith.mulf %34, %39 : vector<8x1xf32>
    %111 = arith.mulf %109, %110 : vector<8x1xf32>
    %112 = arith.addf %45, %47 : vector<8x1xf32>
    %cst_28 = arith.constant 2.000000e+00 : f32
    %113 = vector.broadcast %cst_28 : f32 to vector<8x1xf32>
    %114 = arith.mulf %113, %111 : vector<8x1xf32>
    %115 = arith.subf %112, %114 : vector<8x1xf32>
    %116 = arith.maximumf %95, %115 : vector<8x1xf32>
    %117 = arith.maximumf %106, %115 : vector<8x1xf32>
    %cst_29 = arith.constant 0.000000e+00 : f32
    %118 = vector.broadcast %cst_29 : f32 to vector<8x1xf32>
    %cst_30 = arith.constant 9.99999996E-13 : f32
    %119 = vector.broadcast %cst_30 : f32 to vector<8x1xf32>
    %120 = arith.maximumf %83, %119 : vector<8x1xf32>
    %121 = math.sqrt %120 : vector<8x1xf32>
    %cst_31 = arith.constant 3.000000e-01 : f32
    %122 = vector.broadcast %cst_31 : f32 to vector<8x1xf32>
    %123 = arith.addf %121, %122 : vector<8x1xf32>
    %cst_32 = arith.constant 0.000000e+00 : f32
    %124 = vector.broadcast %cst_32 : f32 to vector<8x1xf32>
    %125 = arith.maximumf %123, %124 : vector<8x1xf32>
    %126 = arith.addf %118, %125 : vector<8x1xf32>
    %cst_33 = arith.constant 9.99999996E-13 : f32
    %127 = vector.broadcast %cst_33 : f32 to vector<8x1xf32>
    %128 = arith.maximumf %105, %127 : vector<8x1xf32>
    %129 = math.sqrt %128 : vector<8x1xf32>
    %cst_34 = arith.constant 3.000000e-01 : f32
    %130 = vector.broadcast %cst_34 : f32 to vector<8x1xf32>
    %131 = arith.addf %129, %130 : vector<8x1xf32>
    %cst_35 = arith.constant 0.000000e+00 : f32
    %132 = vector.broadcast %cst_35 : f32 to vector<8x1xf32>
    %133 = arith.maximumf %131, %132 : vector<8x1xf32>
    %134 = arith.addf %126, %133 : vector<8x1xf32>
    %cst_36 = arith.constant 9.99999996E-13 : f32
    %135 = vector.broadcast %cst_36 : f32 to vector<8x1xf32>
    %136 = arith.maximumf %116, %135 : vector<8x1xf32>
    %137 = math.sqrt %136 : vector<8x1xf32>
    %cst_37 = arith.constant 3.000000e-01 : f32
    %138 = vector.broadcast %cst_37 : f32 to vector<8x1xf32>
    %139 = arith.addf %137, %138 : vector<8x1xf32>
    %cst_38 = arith.constant 0.000000e+00 : f32
    %140 = vector.broadcast %cst_38 : f32 to vector<8x1xf32>
    %141 = arith.maximumf %139, %140 : vector<8x1xf32>
    %142 = arith.addf %134, %141 : vector<8x1xf32>
    %cst_39 = arith.constant 9.99999996E-13 : f32
    %143 = vector.broadcast %cst_39 : f32 to vector<8x1xf32>
    %144 = arith.maximumf %117, %143 : vector<8x1xf32>
    %145 = math.sqrt %144 : vector<8x1xf32>
    %cst_40 = arith.constant 3.000000e-01 : f32
    %146 = vector.broadcast %cst_40 : f32 to vector<8x1xf32>
    %147 = arith.addf %145, %146 : vector<8x1xf32>
    %cst_41 = arith.constant 0.000000e+00 : f32
    %148 = vector.broadcast %cst_41 : f32 to vector<8x1xf32>
    %149 = arith.maximumf %147, %148 : vector<8x1xf32>
    %150 = arith.addf %142, %149 : vector<8x1xf32>
    %c1_i32 = arith.constant 1 : i32
    %151 = arith.muli %arg0, %c1_i32 : i32
    %152 = arith.addi %151, %arg1 : i32
    %c8_i32 = arith.constant 8 : i32
    %153 = arith.muli %152, %c8_i32 : i32
    %154 = tpu.iota {dimensions = array<i32: 0>} : vector<8x1xi32>
    %155 = vector.broadcast %153 : i32 to vector<8x1xi32>
    %156 = arith.addi %155, %154 : vector<8x1xi32>
    %c2_i32 = arith.constant 2 : i32
    %157 = vector.broadcast %c2_i32 : i32 to vector<8x1xi32>
    %158 = arith.cmpi slt, %156, %157 : vector<8x1xi32>
    %cst_42 = arith.constant 0.000000e+00 : f32
    %159 = vector.broadcast %cst_42 : f32 to vector<8x1xf32>
    %160 = arith.select %158, %150, %159 : vector<8x1xi1>, vector<8x1xf32>
    %c0_43 = arith.constant 0 : index
    %c0_44 = arith.constant 0 : index
    %161 = vector.load %arg4[%c0_43, %c0_44] : memref<1x1xf32, #tpu.memory_space<vmem>>, vector<1x1xf32>
    %cst_45 = arith.constant dense<0.000000e+00> : vector<1xf32>
    %162 = vector.multi_reduction <add>, %160, %cst_45 [0] : vector<8x1xf32> to vector<1xf32>
    %163 = vector.shape_cast %162 : vector<1xf32> to vector<1x1xf32>
    %cst_46 = arith.constant 2.500000e-01 : f32
    %164 = vector.broadcast %cst_46 : f32 to vector<1x1xf32>
    %165 = arith.mulf %163, %164 : vector<1x1xf32>
    %166 = arith.addf %161, %165 : vector<1x1xf32>
    %c0_47 = arith.constant 0 : index
    %c0_48 = arith.constant 0 : index
    %167 = vector.load %arg4[%c0_47, %c0_48] : memref<1x1xf32, #tpu.memory_space<vmem>>, vector<1x1xf32>
    tpu.vector_store %arg4[%c0_47, %c0_48], %166 {strides = array<i32>} : memref<1x1xf32, #tpu.memory_space<vmem>>, vector<1x1xf32>,
    %c0_i32_49 = arith.constant 0 : i32
    %168 = arith.cmpi eq, %arg1, %c0_i32_49 : i32
    %169 = arith.extui %168 : i1 to i32
    %c0_i32_50 = arith.constant 0 : i32
    %170 = arith.cmpi ne, %169, %c0_i32_50 : i32
    scf.if %170 {
      %c0_51 = arith.constant 0 : index
      %c0_52 = arith.constant 0 : index
      %171 = vector.load %arg4[%c0_51, %c0_52] : memref<1x1xf32, #tpu.memory_space<vmem>>, vector<1x1xf32>
      %172 = vector.shape_cast %171 : vector<1x1xf32> to vector<1x1x1xf32>
      %173 = vector.shape_cast %172 : vector<1x1x1xf32> to vector<1x1x1xf32>
      %174 = vector.broadcast %173 : vector<1x1x1xf32> to vector<1x8x128xf32>
      %c0_53 = arith.constant 0 : index
      %c0_54 = arith.constant 0 : index
      %c0_55 = arith.constant 0 : index
      %175 = vector.load %arg3[%c0_53, %c0_54, %c0_55] : memref<1x8x128xf32, #tpu.memory_space<vmem>>, vector<1x8x128xf32>
      tpu.vector_store %arg3[%c0_53, %c0_54, %c0_55], %174 {strides = array<i32>} : memref<1x8x128xf32, #tpu.memory_space<vmem>>, vector<1x8x128xf32>,
    } else {
    }
    return
  }
  func.func @transform_0(%arg0: i32, %arg1: i32) -> (i32, i32) {
    %c1_i32 = arith.constant 1 : i32
    %0 = arith.muli %arg0, %c1_i32 : i32
    %1 = arith.addi %0, %arg1 : i32
    %c0_i32 = arith.constant 0 : i32
    %2 = arith.minsi %1, %c0_i32 : i32
    %c0_i32_0 = arith.constant 0 : i32
    %c0_i32_1 = arith.constant 0 : i32
    return %2, %c0_i32_0 : i32, i32
  }
  func.func @transform_1(%arg0: i32, %arg1: i32) -> (i32, i32, i32) {
    %c0_i32 = arith.constant 0 : i32
    %c0_i32_0 = arith.constant 0 : i32
    %c0_i32_1 = arith.constant 0 : i32
    return %arg0, %c0_i32, %c0_i32_0 : i32, i32, i32
  }
}

</mosaic_0001>

<bundles_post_ra>
// kernel: shared_shared_loss.1
= control target key start
LH: loop header
LB: loop body
LE: loop exit
PB: predicated region body
PF: predicated region fallthrough
CT: control target
= control target key end

     0   :  { %s276_s8 = smov 96   ;;  %s277_s9 = smov 64   ;;  %vm43_vm0 = vcmask 261120   ;;  %vm39_vm1 = vcmask 0   ;;  %v279_v24 = vmov 0.0   ;;  %v280_v25 = vmov 0   ;;  %s309_s0 = inlined_call_operand.vmem [shape: f32[8,128], index: 0, kind: input, shape index: {}]   ;;  %s310_s1 = inlined_call_operand.vmem [shape: f32[1,8,128], index: 1, kind: output, shape index: {}]  }
   0x1   :  { %v41_v0 = vld [vmem:[%s309_s0] sm:$0xff]  ;;  %s278_s10 = smov 32   ;;  %40 = vst.msk [vmem:[#allocation2] sm:$0x1] %vm39_vm1, %v279_v24  ;;  %259 = vset.pattern.permute.xlu0 %v280_v25 }
   0x2   :  { %87 = vrot.lane.b32.xlu0 %v41_v0, %s276_s8  ;;  %v42_v1 = vmul.f32 %v41_v0, %v41_v0 }
   0x4   :  { %48 = vrot.lane.b32.xlu1 %v42_v1, %s276_s8  ;;  %v44_v10 = vsel %vm43_vm0, %v42_v1, 0.0 }
   0x6   :  { %99 = vrot.lane.b32.xlu0 %v41_v0, %s277_s9 }
   0x8   :  { %54 = vrot.lane.b32.xlu1 %v42_v1, %s277_s9 }
   0xa   :  { %60 = vrot.lane.b32.xlu0 %v42_v1, %s278_s10 }
   0xc   :  { %112 = vrot.lane.b32.xlu1 %v41_v0, %s278_s10 }
  0x74   :  { %v88_v2 = vpop.permute.xlu0 %87 }
  0x75   :  { %v90_v3 = vmul.f32 %v88_v2, %v41_v0 }
  0x76   :  { %v49_v6 = vpop.permute.xlu1 %48 }
  0x77   :  { %126 = vrot.lane.b32.xlu0 %v90_v3, %s276_s8  ;;  %v51_v7 = vsel %vm43_vm0, %v49_v6, 0.0  ;;  %v91_v15 = vsel %vm43_vm0, %v90_v3, 0.0 }
  0x78   :  { %v100_v4 = vpop.permute.xlu0 %99 }
  0x79   :  { %v102_v5 = vmul.f32 %v100_v4, %v41_v0 }
  0x7a   :  { %v55_v8 = vpop.permute.xlu1 %54 }
  0x7b   :  { %153 = vrot.lane.b32.xlu0 %v90_v3, %s277_s9  ;;  %140 = vrot.lane.b32.xlu1 %v102_v5, %s276_s8  ;;  %v57_v9 = vsel %vm43_vm0, %v55_v8, 0.0  ;;  %v103_v17 = vsel %vm43_vm0, %v102_v5, 0.0 }
  0x7c   :  { %v61_v12 = vpop.permute.xlu0 %60 }
  0x7d   :  { %v63_v14 = vsel %vm43_vm0, %v61_v12, 0.0 }
  0x7e   :  { %v113_v11 = vpop.permute.xlu1 %112 }
  0x7f   :  { %v115_v13 = vmul.f32 %v113_v11, %v41_v0 }
  0x81   :  { %v116_v16 = vsel %vm43_vm0, %v115_v13, 0.0 }
  0x9a   :  { %52 = vadd.xlane.f32.xlu0 %v51_v7 }
  0x9e   :  { %58 = vadd.xlane.f32.xlu0 %v57_v9 }
  0x9f   :  { %45 = vadd.xlane.f32.xlu1 %v44_v10 }
  0xa2   :  { %92 = vadd.xlane.f32.xlu0 %v91_v15 }
  0xa3   :  { %64 = vadd.xlane.f32.xlu1 %v63_v14 }
  0xa6   :  { %117 = vadd.xlane.f32.xlu0 %v116_v16 }
  0xa7   :  { %104 = vadd.xlane.f32.xlu1 %v103_v17 }
  0xe9   :  { %v127_v18 = vpop.permute.xlu0 %126 }
  0xea   :  { %v129_v19 = vsel %vm43_vm0, %v127_v18, 0.0 }
  0xeb   :  { %130 = vadd.xlane.f32.xlu1 %v129_v19 }
  0xed   :  { %v154_v20 = vpop.permute.xlu0 %153  ;;  %v141_v21 = vpop.permute.xlu1 %140 }
  0xee   :  { %v143_v22 = vsel %vm43_vm0, %v141_v21, 0.0  ;;  %v156_v23 = vsel %vm43_vm0, %v154_v20, 0.0 }
  0xef   :  { %144 = vadd.xlane.f32.xlu0 %v143_v22  ;;  %157 = vadd.xlane.f32.xlu1 %v156_v23 }
 0x123   :  { %v53_v26 = vpop.xlane.xlu0 %52 }
 0x124   :  { %260 = vrsqrt.f32 %v53_v26  ;;  %vm69_vm2 = vcmp.gt.f32.partialorder %v53_v26, 1e-24 }
 0x127   :  { %v59_v28 = vpop.xlane.xlu0 %58 }
 0x128   :  { %v46_v27 = vpop.xlane.xlu1 %45  ;;  %262 = vrsqrt.f32 %v59_v28  ;;  %vm72_vm3 = vcmp.gt.f32.partialorder %v59_v28, 1e-24 }
 0x129   :  { %264 = vrsqrt.f32 %v46_v27  ;;  %vm66_vm4 = vcmp.gt.f32.partialorder %v46_v27, 1e-24 }
 0x12b   :  { %v93_v38 = vpop.xlane.xlu0 %92 }
 0x12c   :  { %v65_v29 = vpop.xlane.xlu1 %64 }
 0x12d   :  { %266 = vrsqrt.f32 %v65_v29  ;;  %vm75_vm5 = vcmp.gt.f32.partialorder %v65_v29, 1e-24 }
 0x12f   :  { %v118_v48 = vpop.xlane.xlu0 %117 }
 0x130   :  { %v105_v47 = vpop.xlane.xlu1 %104 }
 0x131   :  { %v261_v30 = vpop.eup %260 }
 0x132   :  { %v71_v34 = vsel %vm69_vm2, %v261_v30, 1e+12 }
 0x133   :  { %v80_v37 = vmul.f32 %v71_v34, %v53_v26 }
 0x135   :  { %v263_v31 = vpop.eup %262  ;;  %v81_v46 = vmul.f32 %v80_v37, %v71_v34 }
 0x136   :  { %v265_v32 = vpop.eup %264  ;;  %v74_v35 = vsel %vm72_vm3, %v263_v31, 1e+12 }
 0x137   :  { %v68_v36 = vsel %vm66_vm4, %v265_v32, 1e+12  ;;  %v82_v40 = vmul.f32 %v74_v35, %v59_v28  ;;  %v132_v2 = vmul.f32 %v74_v35, %v71_v34 }
 0x138   :  { %v78_v41 = vmul.f32 %v68_v36, %v46_v27  ;;  %v94_v42 = vmul.f32 %v71_v34, %v68_v36  ;;  %v106_v43 = vmul.f32 %v74_v35, %v68_v36 }
 0x139   :  { %v83_v49 = vmul.f32 %v82_v40, %v74_v35 }
 0x13a   :  { %v267_v33 = vpop.eup %266  ;;  %v79_v50 = vmul.f32 %v78_v41, %v68_v36  ;;  %v95_v51 = vmul.f32 %v94_v42, %v93_v38  ;;  %v107_v52 = vmul.f32 %v106_v43, %v105_v47 }
 0x13b   :  { %v77_v39 = vsel %vm75_vm5, %v267_v33, 1e+12  ;;  %v134_v6 = vadd.f32 %v83_v49, %v81_v46 }
 0x13c   :  { %v84_v44 = vmul.f32 %v77_v39, %v65_v29  ;;  %v119_v45 = vmul.f32 %v77_v39, %v68_v36  ;;  %v96_v55 = vadd.f32 %v81_v46, %v79_v50  ;;  %v97_v56 = vmul.f32 2.0, %v95_v51 }
 0x13d   :  { %v108_v57 = vadd.f32 %v83_v49, %v79_v50  ;;  %v109_v58 = vmul.f32 2.0, %v107_v52  ;;  %v146_v8 = vmul.f32 %v77_v39, %v71_v34  ;;  %v159_v9 = vmul.f32 %v77_v39, %v74_v35 }
 0x13e   :  { %v85_v53 = vmul.f32 %v84_v44, %v77_v39  ;;  %v120_v54 = vmul.f32 %v119_v45, %v118_v48  ;;  %v98_v61 = vsub.f32 %v96_v55, %v97_v56  ;;  %v212_v45 = vlaneseq }
 0x13f   :  { %v110_v62 = vsub.f32 %v108_v57, %v109_v58 }
 0x140   :  { %v121_v59 = vadd.f32 %v85_v53, %v79_v50  ;;  %v122_v60 = vmul.f32 2.0, %v120_v54  ;;  %v148_v15 = vadd.f32 %v85_v53, %v81_v46  ;;  %v161_v17 = vadd.f32 %v85_v53, %v83_v49 }
 0x141   :  { %v111_v0 = vmax.f32 %v98_v61, %v110_v62  ;;  %v213_v55 = vshrl.u32 %v212_v45, 7 }
 0x142   :  { %v123_v63 = vsub.f32 %v121_v59, %v122_v60 }
 0x143   :  { %vm216_vm14 = vcmp.lt.s32.totalorder %v213_v55, 2 }
 0x144   :  { %v124_v1 = vmax.f32 %v111_v0, %v123_v63 }
 0x146   :  { %v166_v3 = vmax.f32 %v124_v1, 1e-12 }
 0x148   :  { %268 = vrsqrt.f32 %v166_v3  ;;  %vm169_vm6 = vcmp.eq.f32.partialorder %v166_v3, inf  ;;  %v172_v33 = vand.u32 2147483648, %v166_v3  ;;  %vm171_vm7 = vcmp.eq.f32.partialorder %v166_v3, 0.0 }
 0x155   :  { %v269_v29 = vpop.eup %268 }
 0x156   :  { %v168_v31 = vmul.f32 %v269_v29, %v166_v3 }
 0x158   :  { %v170_v32 = vsel %vm169_vm6, %v166_v3, %v168_v31 }
 0x159   :  { %v173_v34 = vsel %vm171_vm7, %v172_v33, %v170_v32 }
 0x15a   :  { %v174_v38 = vadd.f32 0.3, %v173_v34 }
 0x15c   :  { %v175_v52 = vmax.f32 %v174_v38, 0.0 }
 0x174   :  { %v131_v4 = vpop.xlane.xlu1 %130 }
 0x175   :  { %v133_v5 = vmul.f32 %v132_v2, %v131_v4 }
 0x177   :  { %v135_v7 = vmul.f32 2.0, %v133_v5 }
 0x178   :  { %v145_v10 = vpop.xlane.xlu0 %144  ;;  %v158_v11 = vpop.xlane.xlu1 %157 }
 0x179   :  { %v136_v12 = vsub.f32 %v134_v6, %v135_v7  ;;  %v147_v13 = vmul.f32 %v146_v8, %v145_v10  ;;  %v160_v14 = vmul.f32 %v159_v9, %v158_v11  ;;  %v218_v6 = vld [vmem:[#allocation2] sm:$0x1] }
 0x17b   :  { %v149_v16 = vmul.f32 2.0, %v147_v13  ;;  %v162_v18 = vmul.f32 2.0, %v160_v14  ;;  %v137_v19 = vmax.f32 %v98_v61, %v136_v12  ;;  %v138_v20 = vmax.f32 %v110_v62, %v136_v12 }
 0x17d   :  { %v150_v21 = vsub.f32 %v148_v15, %v149_v16  ;;  %v163_v22 = vsub.f32 %v161_v17, %v162_v18 }
 0x17f   :  { %v151_v23 = vmax.f32 %v137_v19, %v150_v21  ;;  %v152_v24 = vmax.f32 %v123_v63, %v150_v21  ;;  %v164_v25 = vmax.f32 %v138_v20, %v163_v22 }
 0x181   :  { %v177_v26 = vmax.f32 %v151_v23, 1e-12  ;;  %v165_v27 = vmax.f32 %v152_v24, %v163_v22  ;;  %v188_v28 = vmax.f32 %v164_v25, 1e-12 }
 0x183   :  { %270 = vrsqrt.f32 %v177_v26  ;;  %v199_v30 = vmax.f32 %v165_v27, 1e-12  ;;  %vm180_vm8 = vcmp.eq.f32.partialorder %v177_v26, inf  ;;  %v183_v39 = vand.u32 2147483648, %v177_v26 }
 0x184   :  { %272 = vrsqrt.f32 %v188_v28  ;;  %vm182_vm9 = vcmp.eq.f32.partialorder %v177_v26, 0.0  ;;  %vm191_vm10 = vcmp.eq.f32.partialorder %v188_v28, inf  ;;  %v194_v42 = vand.u32 2147483648, %v188_v28 }
 0x185   :  { %274 = vrsqrt.f32 %v199_v30  ;;  %vm193_vm11 = vcmp.eq.f32.partialorder %v188_v28, 0.0  ;;  %vm202_vm12 = vcmp.eq.f32.partialorder %v199_v30, inf  ;;  %v205_v51 = vand.u32 2147483648, %v199_v30 }
 0x186   :  { %vm204_vm13 = vcmp.eq.f32.partialorder %v199_v30, 0.0 }
 0x190   :  { %v271_v35 = vpop.eup %270 }
 0x191   :  { %v273_v36 = vpop.eup %272  ;;  %v179_v37 = vmul.f32 %v271_v35, %v177_v26 }
 0x192   :  { %v190_v40 = vmul.f32 %v273_v36, %v188_v28  ;;  %v275_v43 = vpop.eup %274 }
 0x193   :  { %v181_v41 = vsel %vm180_vm8, %v177_v26, %v179_v37  ;;  %v201_v49 = vmul.f32 %v275_v43, %v199_v30 }
 0x194   :  { %v184_v44 = vsel %vm182_vm9, %v183_v39, %v181_v41  ;;  %v192_v46 = vsel %vm191_vm10, %v188_v28, %v190_v40 }
 0x195   :  { %v185_v47 = vadd.f32 0.3, %v184_v44  ;;  %v195_v48 = vsel %vm193_vm11, %v194_v42, %v192_v46  ;;  %v203_v54 = vsel %vm202_vm12, %v199_v30, %v201_v49 }
 0x196   :  { %v196_v50 = vadd.f32 0.3, %v195_v48  ;;  %v206_v56 = vsel %vm204_vm13, %v205_v51, %v203_v54 }
 0x197   :  { %v186_v53 = vmax.f32 %v185_v47, 0.0  ;;  %v207_v59 = vadd.f32 0.3, %v206_v56 }
 0x198   :  { %v197_v58 = vmax.f32 %v196_v50, 0.0 }
 0x199   :  { %v187_v57 = vadd.f32 %v186_v53, %v175_v52  ;;  %v208_v61 = vmax.f32 %v207_v59, 0.0 }
 0x19b   :  { %v198_v60 = vadd.f32 %v197_v58, %v187_v57 }
 0x19d   :  { %v209_v62 = vadd.f32 %v208_v61, %v198_v60 }
 0x19f   :  { %v217_v63 = vsel %vm216_vm14, %v209_v62, 0.0 }
 0x1a0   :  { %v219_v0 = vrot.slane %v217_v63, 4 }
 0x1a2   :  { %v220_v1 = vadd.f32 %v219_v0, %v217_v63 }
 0x1a4   :  { %v221_v2 = vrot.slane %v220_v1, 2 }
 0x1a6   :  { %v222_v3 = vadd.f32 %v221_v2, %v220_v1 }
 0x1a8   :  { %v223_v4 = vrot.slane %v222_v3, 1 }
 0x1aa   :  { %v224_v5 = vadd.f32 %v223_v4, %v222_v3 }
 0x1ac   :  { %v225_v7 = vmul.f32 0.25, %v224_v5 }
 0x1ae   :  { %v226_v8 = vadd.f32 %v225_v7, %v218_v6 }
 0x1b0   :  { %228 = vst.msk [vmem:[#allocation2] sm:$0x1] %vm39_vm1, %v226_v8 }
 0x1b7   :  { %v253_v9 = vld [vmem:[#allocation2] ss:$0 sm:$0xff] }
 0x1b8   :  { %239 = vperm.xlu0 %259, %v253_v9  }
 0x233   :  { %v240_v10 = vpop.permute.xlu0 %239 }
 0x234   :  { %242 = vst [vmem:[%s310_s1] sm:$0xff] %v240_v10 }

</bundles_post_ra>
